<compile_context>
chip_gen: v5e
topology: v5e:2x2
jax: 0.10.0
libtpu: 0.0.40
codegen_flags: <defaults>
</compile_context>

<pallas_src>
import functools

import jax
import jax.numpy as jnp
from jax.experimental import pallas as pl
from jax.experimental.pallas import tpu as pltpu


def _round_up(v, m):
    return ((v + m - 1) // m) * m


def _pick_tile(n_pad, max_tile):
    """Largest multiple of 128 that divides n_pad and is <= max_tile."""
    best = 128
    t = 128
    while t <= min(max_tile, n_pad):
        if n_pad % t == 0:
            best = t
        t += 128
    return best


def _tpu_tuning():
    """Per-generation (tm_max, tk_max, vmem_limit_bytes)."""
    kind = ""
    try:
        kind = jax.devices()[0].device_kind.lower()
    except Exception:
        pass
    if "v7" in kind:                    # 64 MiB VMEM per TensorCore: cap tiles & scoped limit
        return 512, 512, 44 * 1024 * 1024
    if "v5" in kind or "v6" in kind:    # 128 MiB VMEM: bigger tiles, deeper pipeline
        return 1024, 1024, 100 * 1024 * 1024
    return 512, 512, 32 * 1024 * 1024   # unknown backend: conservative defaults


# ----------------------------------------------------------------------------
# Pass 1: h = ReLU(A_norm @ XW + bias), plus per-row-tile BN partial sums
# ----------------------------------------------------------------------------

def gcn_agg_kernel(a_ref, xw_ref, p_ref, h_ref, stats_ref, *, n_real, tm):
    """Grid = (m row-tiles [parallel], k A-column tiles [reduction, arbitrary]).

    a_ref     : (tm, tk)      bf16  A_norm[m-tile, k-tile]
    xw_ref    : (tk, H_pad)   bf16  (X @ W)[k-tile, :]
    p_ref     : (8, H_pad)    f32   row 0 = conv bias
    h_ref     : (tm, H_pad)   f32   resident accumulator -> ReLU(conv) output
    stats_ref : (8, H_pad)    f32   row 0 = masked column sum, row 1 = masked column sum-of-squares
    """
    m = pl.program_id(0)
    k = pl.program_id(1)

    prod = jnp.dot(a_ref[...], xw_ref[...], preferred_element_type=jnp.float32)

    @pl.when(k == 0)
    def _store():                       # direct store: no zero-init + accumulate round trip
        h_ref[...] = prod

    @pl.when(k > 0)
    def _accum():
        h_ref[...] += prod

    @pl.when(k == pl.num_programs(1) - 1)
    def _finalize():
        bias = p_ref[0:1, :]
        h = jnp.maximum(h_ref[...] + bias, 0.0)          # conv bias + ReLU
        h_ref[...] = h

        # Masked BN partial statistics (padded node rows excluded). (tm,1) mask broadcasts.
        row_ids = jax.lax.broadcasted_iota(jnp.int32, (h.shape[0], 1), 0) + m * tm
        hm = jnp.where(row_ids < n_real, h, 0.0)
        stats_ref[...] = jnp.zeros_like(stats_ref)
        stats_ref[0:1, :] = jnp.sum(hm, axis=0, keepdims=True)
        stats_ref[1:2, :] = jnp.sum(hm * hm, axis=0, keepdims=True)


# ----------------------------------------------------------------------------
# Pass 2: y = h * scale + shift   (BatchNorm affine with globally-reduced stats)
# ----------------------------------------------------------------------------

def bn_apply_kernel(h_ref, p_ref, o_ref):
    """h_ref: (tm, H_pad) f32; p_ref: (8, H_pad) f32 (row 0 = scale, row 1 = shift)."""
    o_ref[...] = h_ref[...] * p_ref[0:1, :] + p_ref[1:2, :]


# ----------------------------------------------------------------------------
# Plain-JAX glue + wrapper
# ----------------------------------------------------------------------------

def build_norm_adj(edge_index, num_nodes):
    """Dense symmetric-normalized adjacency with self loops, matching GCNConvWithM."""
    src, dst = edge_index[0], edge_index[1]                    # row, col
    loop = jnp.arange(num_nodes, dtype=edge_index.dtype)
    row = jnp.concatenate([src, loop])
    col = jnp.concatenate([dst, loop])
    deg = jnp.zeros((num_nodes,), jnp.float32).at[col].add(1.0)          # degree(col, N)
    dinv = jnp.where(deg > 0, jax.lax.rsqrt(jnp.maximum(deg, 1.0)), 0.0)  # no inf/NaN
    norm = dinv[row] * dinv[col]
    # out[col] += norm * x[row]   <=>   A[col, row] += norm
    return jnp.zeros((num_nodes, num_nodes), jnp.float32).at[col, row].add(norm)


def gcnm_block_forward(x, edge_index, w, bias, gamma, beta, *, eps=1e-5):
    """GCNMBlock.forward: BatchNorm1d(ReLU(GCNConvWithM(x, edge_index)))."""
    n, _ = x.shape
    h_dim = w.shape[1]

    tm_max, tk_max, vmem_limit = _tpu_tuning()

    # Lane-dense padding: features to 128, nodes only to 128 (not to tk) to avoid wasted A traffic.
    h_pad = _round_up(h_dim, 128)
    n_pad = _round_up(n, 128)
    tm = _pick_tile(n_pad, tm_max)
    tk = _pick_tile(n_pad, tk_max)
    num_m = n_pad // tm
    num_k = n_pad // tk

    # Hoisted prologue matmul: XW = X @ W (bf16 operands, f32 acc), then bf16 for the A stream.
    xw = jnp.dot(x.astype(jnp.bfloat16), w.astype(jnp.bfloat16),
                 preferred_element_type=jnp.float32)
    xw_p = jnp.pad(xw, ((0, n_pad - n), (0, h_pad - h_dim))).astype(jnp.bfloat16)

    a = build_norm_adj(edge_index, n)
    a_p = jnp.pad(a, ((0, n_pad - n), (0, n_pad - n))).astype(jnp.bfloat16)

    # Pass-1 parameter block: row 0 = conv bias.
    params1 = jnp.zeros((8, h_pad), jnp.float32).at[0, :h_dim].set(bias)

    agg = functools.partial(gcn_agg_kernel, n_real=n, tm=tm)
    h_full, stats = pl.pallas_call(
        agg,
        out_shape=(jax.ShapeDtypeStruct((n_pad, h_pad), jnp.float32),
                   jax.ShapeDtypeStruct((num_m * 8, h_pad), jnp.float32)),
        grid=(num_m, num_k),
        in_specs=[
            pl.BlockSpec((tm, tk), lambda m, k: (m, k)),        # A_norm tiles
            pl.BlockSpec((tk, h_pad), lambda m, k: (k, 0)),     # XW row tiles
            pl.BlockSpec((8, h_pad), lambda m, k: (0, 0)),      # packed bias
        ],
        out_specs=(
            pl.BlockSpec((tm, h_pad), lambda m, k: (m, 0)),     # resident accumulator / h
            pl.BlockSpec((8, h_pad), lambda m, k: (m, 0)),      # per-tile BN partial stats
        ),
        compiler_params=pltpu.CompilerParams(
            dimension_semantics=("parallel", "arbitrary"),       # m across cores, k reduction
            vmem_limit_bytes=vmem_limit),
    )(a_p, xw_p, params1)

    # Global BN statistics: tiny reduction over m tiles (plain XLA).
    stats = stats.reshape(num_m, 8, h_pad)
    total_sum = jnp.sum(stats[:, 0, :], axis=0)                  # (h_pad,)
    total_sq = jnp.sum(stats[:, 1, :], axis=0)
    inv_n = 1.0 / float(n)
    mean = total_sum * inv_n
    var = jnp.maximum(total_sq * inv_n - mean * mean, 0.0)       # clamp single-pass cancellation

    gamma_p = jnp.zeros((h_pad,), jnp.float32).at[:h_dim].set(gamma)
    beta_p = jnp.zeros((h_pad,), jnp.float32).at[:h_dim].set(beta)
    scale = gamma_p * jax.lax.rsqrt(var + eps)
    shift = beta_p - mean * scale

    params2 = jnp.zeros((8, h_pad), jnp.float32)
    params2 = params2.at[0, :].set(scale)
    params2 = params2.at[1, :].set(shift)

    # Pass 2: elementwise normalize, row-tiled and fully parallel.
    out = pl.pallas_call(
        bn_apply_kernel,
        out_shape=jax.ShapeDtypeStruct((n_pad, h_pad), jnp.float32),
        grid=(num_m,),
        in_specs=[
            pl.BlockSpec((tm, h_pad), lambda m: (m, 0)),
            pl.BlockSpec((8, h_pad), lambda m: (0, 0)),
        ],
        out_specs=pl.BlockSpec((tm, h_pad), lambda m: (m, 0)),
        compiler_params=pltpu.CompilerParams(
            dimension_semantics=("parallel",),
            vmem_limit_bytes=vmem_limit),
    )(h_full, params2)

    return out[:n, :h_dim]


def gcnm_block_reference(x, edge_index, w, bias, gamma, beta, eps=1e-5):
    """Pure-JAX reference with the same bf16 operand quantization as the kernel."""
    n = x.shape[0]
    a = build_norm_adj(edge_index, n).astype(jnp.bfloat16).astype(jnp.float32)
    xw = jnp.dot(x.astype(jnp.bfloat16), w.astype(jnp.bfloat16),
                 preferred_element_type=jnp.float32)
    xw = xw.astype(jnp.bfloat16).astype(jnp.float32)
    h = jnp.maximum(jnp.dot(a, xw) + bias[None, :], 0.0)
    mean = jnp.mean(h, axis=0, keepdims=True)
    var = jnp.mean(jnp.square(h - mean), axis=0, keepdims=True)
    return (h - mean) * jax.lax.rsqrt(var + eps) * gamma[None, :] + beta[None, :]


# ----------------------------------------------------------------------------
# Main
# ----------------------------------------------------------------------------

if __name__ == "__main__":
    key = jax.random.PRNGKey(0)

    # Small batched graph: 2 graphs with 6 + 8 = 14 nodes, 16-dim node features.
    graph_sizes = [6, 8]
    num_nodes = sum(graph_sizes)
    in_channels = 16
    hidden = 32

    key, kx, kw = jax.random.split(key, 3)
    x = jax.random.normal(kx, (num_nodes, in_channels), jnp.float32)

    # Deterministic directed intra-graph edges (src, dst).
    edges = []
    offset = 0
    for g, n_g in enumerate(graph_sizes):
        for i in range(n_g):
            for j in range(n_g):
                if i != j and (i * 7 + j * 3 + g) % 4 == 0:
                    edges.append((offset + i, offset + j))
        offset += n_g
    edge_index = jnp.array(edges, jnp.int32).T                   # (2, E)

    # GCNConvWithM params: lin has no bias; conv bias zero-init; BN gamma=1, beta=0.
    w = jax.random.normal(kw, (in_channels, hidden), jnp.float32) / jnp.sqrt(float(in_channels))
    bias = jnp.zeros((hidden,), jnp.float32)
    gamma = jnp.ones((hidden,), jnp.float32)
    beta = jnp.zeros((hidden,), jnp.float32)

    fwd = jax.jit(gcnm_block_forward)
    out = fwd(x, edge_index, w, bias, gamma, beta)
    jax.block_until_ready(out)

    ref = gcnm_block_reference(x, edge_index, w, bias, gamma, beta)
    assert out.shape == (num_nodes, hidden)
    assert bool(jnp.all(jnp.isfinite(out)))
    max_err = float(jnp.max(jnp.abs(out - ref)))
    assert max_err < 1e-2, f"max |kernel - reference| = {max_err}"
    print("KERNEL_OK")
</pallas_src>

<mosaic_0001>
module attributes {stable_mosaic.version = 11 : i64} {
  func.func @gcn_agg_kernel(%arg0: i32, %arg1: i32, %arg2: memref<128x128xbf16, #tpu.memory_space<vmem>>, %arg3: memref<128x128xbf16, #tpu.memory_space<vmem>>, %arg4: memref<8x128xf32, #tpu.memory_space<vmem>>, %arg5: memref<128x128xf32, #tpu.memory_space<vmem>>, %arg6: memref<8x128xf32, #tpu.memory_space<vmem>>) attributes {dimension_semantics = [#tpu.dimension_semantics<parallel>, #tpu.dimension_semantics<arbitrary>], iteration_bounds = array<i64: 1, 1>, scalar_prefetch = 0 : i64, scratch_operands = 0 : i64, tpu.core_type = #tpu.core_type<tc>, window_params = [{transform_indices = @transform_0, window_bounds = array<i64: 128, 128>}, {transform_indices = @transform_1, window_bounds = array<i64: 128, 128>}, {pipeline_mode = #tpu.pipeline_mode<synchronous>, transform_indices = @transform_2, window_bounds = array<i64: 8, 128>}, {transform_indices = @transform_3, window_bounds = array<i64: 128, 128>}, {transform_indices = @transform_4, window_bounds = array<i64: 8, 128>}]} {
    %c0 = arith.constant 0 : index
    %c0_0 = arith.constant 0 : index
    %0 = vector.load %arg2[%c0, %c0_0] : memref<128x128xbf16, #tpu.memory_space<vmem>>, vector<128x128xbf16>
    %c0_1 = arith.constant 0 : index
    %c0_2 = arith.constant 0 : index
    %1 = vector.load %arg3[%c0_1, %c0_2] : memref<128x128xbf16, #tpu.memory_space<vmem>>, vector<128x128xbf16>
    %cst = arith.constant dense<0.000000e+00> : vector<128x128xf32>
    %2 = tpu.matmul %0, %1, %cst {dimension_numbers = #tpu.dot_dimension_numbers<[1], [0], [0], [1], [0, 0, 1, 1], [], []>} : vector<128x128xbf16>, vector<128x128xbf16>, vector<128x128xf32> -> vector<128x128xf32>
    %c0_i32 = arith.constant 0 : i32
    %3 = arith.cmpi eq, %arg1, %c0_i32 : i32
    %4 = arith.extui %3 : i1 to i32
    %c0_i32_3 = arith.constant 0 : i32
    %5 = arith.cmpi ne, %4, %c0_i32_3 : i32
    scf.if %5 {
      %c0_8 = arith.constant 0 : index
      %c0_9 = arith.constant 0 : index
      %12 = vector.load %arg5[%c0_8, %c0_9] : memref<128x128xf32, #tpu.memory_space<vmem>>, vector<128x128xf32>
      tpu.vector_store %arg5[%c0_8, %c0_9], %2 {strides = array<i32>} : memref<128x128xf32, #tpu.memory_space<vmem>>, vector<128x128xf32>,
    } else {
    }
    %c0_i32_4 = arith.constant 0 : i32
    %6 = arith.cmpi sgt, %arg1, %c0_i32_4 : i32
    %7 = arith.extui %6 : i1 to i32
    %c0_i32_5 = arith.constant 0 : i32
    %8 = arith.cmpi ne, %7, %c0_i32_5 : i32
    scf.if %8 {
      %c0_8 = arith.constant 0 : index
      %c0_9 = arith.constant 0 : index
      %12 = vector.load %arg5[%c0_8, %c0_9] : memref<128x128xf32, #tpu.memory_space<vmem>>, vector<128x128xf32>
      %13 = arith.addf %12, %2 : vector<128x128xf32>
      %c0_10 = arith.constant 0 : index
      %c0_11 = arith.constant 0 : index
      %14 = vector.load %arg5[%c0_10, %c0_11] : memref<128x128xf32, #tpu.memory_space<vmem>>, vector<128x128xf32>
      tpu.vector_store %arg5[%c0_10, %c0_11], %13 {strides = array<i32>} : memref<128x128xf32, #tpu.memory_space<vmem>>, vector<128x128xf32>,
    } else {
    }
    %c0_i32_6 = arith.constant 0 : i32
    %9 = arith.cmpi eq, %arg1, %c0_i32_6 : i32
    %10 = arith.extui %9 : i1 to i32
    %c0_i32_7 = arith.constant 0 : i32
    %11 = arith.cmpi ne, %10, %c0_i32_7 : i32
    scf.if %11 {
      %c0_8 = arith.constant 0 : index
      %c0_9 = arith.constant 0 : index
      %12 = vector.load %arg4[%c0_8, %c0_9] : memref<8x128xf32, #tpu.memory_space<vmem>>, vector<1x128xf32>
      %c0_10 = arith.constant 0 : index
      %c0_11 = arith.constant 0 : index
      %13 = vector.load %arg5[%c0_10, %c0_11] : memref<128x128xf32, #tpu.memory_space<vmem>>, vector<128x128xf32>
      %14 = vector.broadcast %12 : vector<1x128xf32> to vector<128x128xf32>
      %15 = arith.addf %13, %14 : vector<128x128xf32>
      %cst_12 = arith.constant 0.000000e+00 : f32
      %16 = vector.broadcast %cst_12 : f32 to vector<128x128xf32>
      %17 = arith.maximumf %15, %16 : vector<128x128xf32>
      %c0_13 = arith.constant 0 : index
      %c0_14 = arith.constant 0 : index
      %18 = vector.load %arg5[%c0_13, %c0_14] : memref<128x128xf32, #tpu.memory_space<vmem>>, vector<128x128xf32>
      tpu.vector_store %arg5[%c0_13, %c0_14], %17 {strides = array<i32>} : memref<128x128xf32, #tpu.memory_space<vmem>>, vector<128x128xf32>,
      %19 = tpu.iota {dimensions = array<i32: 0>} : vector<128x1xi32>
      %c128_i32 = arith.constant 128 : i32
      %20 = arith.muli %arg0, %c128_i32 : i32
      %21 = vector.broadcast %20 : i32 to vector<128x1xi32>
      %22 = arith.addi %19, %21 : vector<128x1xi32>
      %c14_i32 = arith.constant 14 : i32
      %23 = vector.broadcast %c14_i32 : i32 to vector<128x1xi32>
      %24 = arith.cmpi slt, %22, %23 : vector<128x1xi32>
      %cst_15 = arith.constant 0.000000e+00 : f32
      %25 = vector.shape_cast %24 : vector<128x1xi1> to vector<128x1xi1>
      %26 = vector.broadcast %25 : vector<128x1xi1> to vector<128x128xi1>
      %27 = vector.broadcast %cst_15 : f32 to vector<128x128xf32>
      %28 = arith.select %26, %17, %27 : vector<128x128xi1>, vector<128x128xf32>
      %cst_16 = arith.constant 0.000000e+00 : f32
      %29 = vector.broadcast %cst_16 : f32 to vector<8x128xf32>
      %c0_17 = arith.constant 0 : index
      %c0_18 = arith.constant 0 : index
      %30 = vector.load %arg6[%c0_17, %c0_18] : memref<8x128xf32, #tpu.memory_space<vmem>>, vector<8x128xf32>
      tpu.vector_store %arg6[%c0_17, %c0_18], %29 {strides = array<i32>} : memref<8x128xf32, #tpu.memory_space<vmem>>, vector<8x128xf32>,
      %cst_19 = arith.constant dense<0.000000e+00> : vector<128xf32>
      %31 = vector.multi_reduction <add>, %28, %cst_19 [0] : vector<128x128xf32> to vector<128xf32>
      %32 = vector.shape_cast %31 : vector<128xf32> to vector<1x128xf32>
      %c0_20 = arith.constant 0 : index
      %c0_21 = arith.constant 0 : index
      %33 = vector.load %arg6[%c0_20, %c0_21] : memref<8x128xf32, #tpu.memory_space<vmem>>, vector<1x128xf32>
      tpu.vector_store %arg6[%c0_20, %c0_21], %32 {strides = array<i32>} : memref<8x128xf32, #tpu.memory_space<vmem>>, vector<1x128xf32>,
      %34 = arith.mulf %28, %28 : vector<128x128xf32>
      %cst_22 = arith.constant dense<0.000000e+00> : vector<128xf32>
      %35 = vector.multi_reduction <add>, %34, %cst_22 [0] : vector<128x128xf32> to vector<128xf32>
      %36 = vector.shape_cast %35 : vector<128xf32> to vector<1x128xf32>
      %c1 = arith.constant 1 : index
      %c0_23 = arith.constant 0 : index
      %37 = vector.load %arg6[%c1, %c0_23] : memref<8x128xf32, #tpu.memory_space<vmem>>, vector<1x128xf32>
      tpu.vector_store %arg6[%c1, %c0_23], %36 {strides = array<i32>} : memref<8x128xf32, #tpu.memory_space<vmem>>, vector<1x128xf32>,
    } else {
    }
    return
  }
  func.func @transform_0(%arg0: i32, %arg1: i32) -> (i32, i32) {
    %c0_i32 = arith.constant 0 : i32
    return %arg0, %arg1 : i32, i32
  }
  func.func @transform_1(%arg0: i32, %arg1: i32) -> (i32, i32) {
    %c0_i32 = arith.constant 0 : i32
    %c0_i32_0 = arith.constant 0 : i32
    return %arg1, %c0_i32 : i32, i32
  }
  func.func @transform_2(%arg0: i32, %arg1: i32) -> (i32, i32) {
    %c0_i32 = arith.constant 0 : i32
    %c0_i32_0 = arith.constant 0 : i32
    %c0_i32_1 = arith.constant 0 : i32
    return %c0_i32, %c0_i32_0 : i32, i32
  }
  func.func @transform_3(%arg0: i32, %arg1: i32) -> (i32, i32) {
    %c0_i32 = arith.constant 0 : i32
    %c0_i32_0 = arith.constant 0 : i32
    return %arg0, %c0_i32 : i32, i32
  }
  func.func @transform_4(%arg0: i32, %arg1: i32) -> (i32, i32) {
    %c0_i32 = arith.constant 0 : i32
    %c0_i32_0 = arith.constant 0 : i32
    return %arg0, %c0_i32 : i32, i32
  }
}

module attributes {stable_mosaic.version = 11 : i64} {
  func.func @bn_apply_kernel(%arg0: i32, %arg1: memref<128x128xf32, #tpu.memory_space<vmem>>, %arg2: memref<8x128xf32, #tpu.memory_space<vmem>>, %arg3: memref<128x128xf32, #tpu.memory_space<vmem>>) attributes {dimension_semantics = [#tpu.dimension_semantics<parallel>], iteration_bounds = array<i64: 1>, scalar_prefetch = 0 : i64, scratch_operands = 0 : i64, tpu.core_type = #tpu.core_type<tc>, window_params = [{transform_indices = @transform_0, window_bounds = array<i64: 128, 128>}, {pipeline_mode = #tpu.pipeline_mode<synchronous>, transform_indices = @transform_1, window_bounds = array<i64: 8, 128>}, {transform_indices = @transform_2, window_bounds = array<i64: 128, 128>}]} {
    %c0 = arith.constant 0 : index
    %c0_0 = arith.constant 0 : index
    %0 = vector.load %arg1[%c0, %c0_0] : memref<128x128xf32, #tpu.memory_space<vmem>>, vector<128x128xf32>
    %c0_1 = arith.constant 0 : index
    %c0_2 = arith.constant 0 : index
    %1 = vector.load %arg2[%c0_1, %c0_2] : memref<8x128xf32, #tpu.memory_space<vmem>>, vector<1x128xf32>
    %2 = vector.broadcast %1 : vector<1x128xf32> to vector<128x128xf32>
    %3 = arith.mulf %0, %2 : vector<128x128xf32>
    %c1 = arith.constant 1 : index
    %c0_3 = arith.constant 0 : index
    %4 = vector.load %arg2[%c1, %c0_3] : memref<8x128xf32, #tpu.memory_space<vmem>>, vector<1x128xf32>
    %5 = vector.broadcast %4 : vector<1x128xf32> to vector<128x128xf32>
    %6 = arith.addf %3, %5 : vector<128x128xf32>
    %c0_4 = arith.constant 0 : index
    %c0_5 = arith.constant 0 : index
    %7 = vector.load %arg3[%c0_4, %c0_5] : memref<128x128xf32, #tpu.memory_space<vmem>>, vector<128x128xf32>
    tpu.vector_store %arg3[%c0_4, %c0_5], %6 {strides = array<i32>} : memref<128x128xf32, #tpu.memory_space<vmem>>, vector<128x128xf32>,
    return
  }
  func.func @transform_0(%arg0: i32) -> (i32, i32) {
    %c0_i32 = arith.constant 0 : i32
    %c0_i32_0 = arith.constant 0 : i32
    return %arg0, %c0_i32 : i32, i32
  }
  func.func @transform_1(%arg0: i32) -> (i32, i32) {
    %c0_i32 = arith.constant 0 : i32
    %c0_i32_0 = arith.constant 0 : i32
    %c0_i32_1 = arith.constant 0 : i32
    return %c0_i32, %c0_i32_0 : i32, i32
  }
  func.func @transform_2(%arg0: i32) -> (i32, i32) {
    %c0_i32 = arith.constant 0 : i32
    %c0_i32_0 = arith.constant 0 : i32
    return %arg0, %c0_i32 : i32, i32
  }
}

</mosaic_0001>

<bundles_post_ra>
// kernel: mul.6
= control target key start
LH: loop header
LB: loop body
LE: loop exit
PB: predicated region body
PF: predicated region fallthrough
CT: control target
= control target key end

     0   :  { %s34_s0 = inlined_call_operand.vmem [shape: f32[36], index: 0, kind: input, shape index: {}]   ;;  %s35_s1 = inlined_call_operand.vmem [shape: f32[36], index: 1, kind: input, shape index: {}]   ;;  %s36_s2 = inlined_call_operand.vmem [shape: f32[36], index: 2, kind: output, shape index: {}]  }
   0x1   :  { %v3_v0 = vld [vmem:[%s34_s0] sm:$0x1] }
   0x2   :  { %v4_v1 = vld [vmem:[%s35_s1] sm:$0x1] }
   0x3   :  { %v7_v2 = vmul.f32 %v4_v1, %v3_v0 }
   0x5   :  { %9 = vst [vmem:[%s36_s2] sm:$0x1] %v7_v2 }

// kernel: gcnm_block_forward.3
= control target key start
LH: loop header
LB: loop body
LE: loop exit
PB: predicated region body
PF: predicated region fallthrough
CT: control target
= control target key end

     0   :  { %s202_s0 = inlined_call_operand.vmem [shape: f32[128,128], index: 0, kind: input, shape index: {}]   ;;  %s203_s1 = inlined_call_operand.vmem [shape: f32[8,128], index: 1, kind: input, shape index: {}]   ;;  %s204_s2 = inlined_call_operand.vmem [shape: f32[128,128], index: 2, kind: output, shape index: {}]  }
   0x1   :  { %v11_v0 = vld [vmem:[%s202_s0] sm:$0xff]  ;;  %v12_v3 = vld [vmem:[%s202_s0 + $0x8] sm:$0xff]  ;;  %v13_v6 = vld [vmem:[%s202_s0 + $0x10] sm:$0xff] }
   0x2   :  { %v83_v1 = vld [vmem:[%s203_s1] ss:$0 sm:$0xff]  ;;  %v84_v2 = vld [vmem:[%s203_s1 + $0x1] ss:$0 sm:$0xff]  ;;  %v14_v7 = vld [vmem:[%s202_s0 + $0x18] sm:$0xff] }
   0x3   :  { %v29_v4 = vmul.f32 %v83_v1, %v11_v0  ;;  %v30_v5 = vmul.f32 %v83_v1, %v12_v3  ;;  %v15_v8 = vld [vmem:[%s202_s0 + $0x20] sm:$0xff]  ;;  %v31_v9 = vmul.f32 %v83_v1, %v13_v6  ;;  %v32_v10 = vmul.f32 %v83_v1, %v14_v7  ;;  %v16_v12 = vld [vmem:[%s202_s0 + $0x28] sm:$0xff]  ;;  %v17_v13 = vld [vmem:[%s202_s0 + $0x30] sm:$0xff] }
   0x4   :  { %v33_v11 = vmul.f32 %v83_v1, %v15_v8  ;;  %v18_v14 = vld [vmem:[%s202_s0 + $0x38] sm:$0xff]  ;;  %v34_v17 = vmul.f32 %v83_v1, %v16_v12  ;;  %v35_v18 = vmul.f32 %v83_v1, %v17_v13  ;;  %v19_v19 = vld [vmem:[%s202_s0 + $0x40] sm:$0xff]  ;;  %v20_v20 = vld [vmem:[%s202_s0 + $0x48] sm:$0xff] }
   0x5   :  { %v47_v15 = vadd.f32 %v84_v2, %v29_v4  ;;  %v48_v16 = vadd.f32 %v84_v2, %v30_v5  ;;  %v49_v21 = vadd.f32 %v84_v2, %v31_v9  ;;  %v50_v22 = vadd.f32 %v84_v2, %v32_v10  ;;  %v21_v24 = vld [vmem:[%s202_s0 + $0x50] sm:$0xff]  ;;  %v22_v27 = vld [vmem:[%s202_s0 + $0x58] sm:$0xff]  ;;  %v23_v30 = vld [vmem:[%s202_s0 + $0x60] sm:$0xff] }
   0x6   :  { %v36_v23 = vmul.f32 %v83_v1, %v18_v14  ;;  %v51_v25 = vadd.f32 %v84_v2, %v33_v11  ;;  %v37_v26 = vmul.f32 %v83_v1, %v19_v19  ;;  %v52_v28 = vadd.f32 %v84_v2, %v34_v17  ;;  %v24_v33 = vld [vmem:[%s202_s0 + $0x68] sm:$0xff]  ;;  %v25_v36 = vld [vmem:[%s202_s0 + $0x70] sm:$0xff]  ;;  %v26_v39 = vld [vmem:[%s202_s0 + $0x78] sm:$0xff] }
   0x7   :  { %63 = vst [vmem:[%s204_s2] sm:$0xff] %v47_v15  ;;  %v38_v29 = vmul.f32 %v83_v1, %v20_v20  ;;  %v53_v31 = vadd.f32 %v84_v2, %v35_v18  ;;  %v39_v32 = vmul.f32 %v83_v1, %v21_v24  ;;  %v40_v35 = vmul.f32 %v83_v1, %v22_v27 }
   0x8   :  { %64 = vst [vmem:[%s204_s2 + $0x8] sm:$0xff] %v48_v16  ;;  %v54_v34 = vadd.f32 %v84_v2, %v36_v23  ;;  %v55_v37 = vadd.f32 %v84_v2, %v37_v26  ;;  %v41_v38 = vmul.f32 %v83_v1, %v23_v30  ;;  %v42_v41 = vmul.f32 %v83_v1, %v24_v33 }
   0x9   :  { %65 = vst [vmem:[%s204_s2 + $0x10] sm:$0xff] %v49_v21  ;;  %v56_v40 = vadd.f32 %v84_v2, %v38_v29  ;;  %v57_v42 = vadd.f32 %v84_v2, %v39_v32  ;;  %v43_v43 = vmul.f32 %v83_v1, %v25_v36  ;;  %v58_v44 = vadd.f32 %v84_v2, %v40_v35 }
   0xa   :  { %66 = vst [vmem:[%s204_s2 + $0x18] sm:$0xff] %v50_v22  ;;  %v44_v45 = vmul.f32 %v83_v1, %v26_v39  ;;  %v59_v46 = vadd.f32 %v84_v2, %v41_v38  ;;  %v60_v47 = vadd.f32 %v84_v2, %v42_v41 }
   0xb   :  { %67 = vst [vmem:[%s204_s2 + $0x20] sm:$0xff] %v51_v25  ;;  %v61_v48 = vadd.f32 %v84_v2, %v43_v43 }
   0xc   :  { %68 = vst [vmem:[%s204_s2 + $0x28] sm:$0xff] %v52_v28  ;;  %v62_v49 = vadd.f32 %v84_v2, %v44_v45 }
   0xd   :  { %69 = vst [vmem:[%s204_s2 + $0x30] sm:$0xff] %v53_v31 }
   0xe   :  { %70 = vst [vmem:[%s204_s2 + $0x38] sm:$0xff] %v54_v34 }
   0xf   :  { %71 = vst [vmem:[%s204_s2 + $0x40] sm:$0xff] %v55_v37 }
  0x10   :  { %72 = vst [vmem:[%s204_s2 + $0x48] sm:$0xff] %v56_v40 }
  0x11   :  { %73 = vst [vmem:[%s204_s2 + $0x50] sm:$0xff] %v57_v42 }
  0x12   :  { %74 = vst [vmem:[%s204_s2 + $0x58] sm:$0xff] %v58_v44 }
  0x13   :  { %75 = vst [vmem:[%s204_s2 + $0x60] sm:$0xff] %v59_v46 }
  0x14   :  { %76 = vst [vmem:[%s204_s2 + $0x68] sm:$0xff] %v60_v47 }
  0x15   :  { %77 = vst [vmem:[%s204_s2 + $0x70] sm:$0xff] %v61_v48 }
  0x16   :  { %78 = vst [vmem:[%s204_s2 + $0x78] sm:$0xff] %v62_v49 }

// kernel: gcnm_block_forward.2
= control target key start
LH: loop header
LB: loop body
LE: loop exit
PB: predicated region body
PF: predicated region fallthrough
CT: control target
= control target key end

     0   :  { %v608_v16 = vmov 0.0   ;;  %v334_v18 = vlaneseq  ;;  %s760_s1 = inlined_call_operand.vmem [shape: bf16[128,128], index: 1, kind: input, shape index: {}]   ;;  %s761_s2 = inlined_call_operand.vmem [shape: f32[8,128], index: 2, kind: input, shape index: {}]   ;;  %s762_s0 = inlined_call_operand.vmem [shape: bf16[128,128], index: 0, kind: input, shape index: {}]   ;;  %s763_s4 = inlined_call_operand.vmem [shape: f32[8,128], index: 4, kind: output, shape index: {1}]   ;;  %s764_s3 = inlined_call_operand.vmem [shape: f32[128,128], index: 3, kind: output, shape index: {0}]  }
   0x1   :  { %v581_v0 = vld [vmem:[%s760_s1 + $0x38] sm:$0xff]  ;;  %v580_v1 = vld [vmem:[%s760_s1 + $0x30] sm:$0xff]  ;;  %v579_v2 = vld [vmem:[%s760_s1 + $0x28] sm:$0xff]  ;;  %433 = vst [vmem:[%s763_s4] sm:$0xff] %v608_v16 }
   0x2   :  { %144 = vmatpush.bf16.msra.mxu0 %v581_v0  ;;  %582 = vmatpush.bf16.msra.mxu1 %v581_v0  ;;  %v578_v3 = vld [vmem:[%s760_s1 + $0x20] sm:$0xff]  ;;  %v577_v4 = vld [vmem:[%s760_s1 + $0x18] sm:$0xff]  ;;  %v576_v5 = vld [vmem:[%s760_s1 + $0x10] sm:$0xff]  ;;  %v335_v23 = vshrl.u32 %v334_v18, 7 }
   0x3   :  { %583 = vmatpush.bf16.msra.mxu2 %v581_v0  ;;  %584 = vmatpush.bf16.msra.mxu3 %v581_v0  ;;  %v575_v6 = vld [vmem:[%s760_s1 + $0x8] sm:$0xff]  ;;  %v574_v7 = vld [vmem:[%s760_s1] sm:$0xff]  ;;  %v568_v9 = vld [vmem:[%s762_s0 + $0x10] sm:$0xff] }
   0x4   :  { %v566_v8 = vld [vmem:[%s762_s0] sm:$0xff]  ;;  %v572_v11 = vld [vmem:[%s762_s0 + $0x30] sm:$0xff]  ;;  %v567_v12 = vld [vmem:[%s762_s0 + $0x8] sm:$0xff]  ;;  %v336_v26 = vadd.s32 8, %v335_v23 }
   0x5   :  { %v570_v10 = vld [vmem:[%s762_s0 + $0x20] sm:$0xff]  ;;  %v569_v13 = vld [vmem:[%s762_s0 + $0x18] sm:$0xff]  ;;  %v571_v14 = vld [vmem:[%s762_s0 + $0x28] sm:$0xff] }
   0x6   :  { %145 = vmatpush.bf16.msra.mxu0 %v580_v1  ;;  %585 = vmatpush.bf16.msra.mxu1 %v580_v1  ;;  %v573_v15 = vld [vmem:[%s762_s0 + $0x38] sm:$0xff]  ;;  %v688_v17 = vld [vmem:[%s761_s2] ss:$0 sm:$0xff]  ;;  %vm370_vm0 = vcmp.lt.s32.totalorder %v336_v26, 14 }
   0x7   :  { %586 = vmatpush.bf16.msra.mxu2 %v580_v1  ;;  %587 = vmatpush.bf16.msra.mxu3 %v580_v1 }
   0xa   :  { %146 = vmatpush.bf16.msra.mxu0 %v579_v2  ;;  %588 = vmatpush.bf16.msra.mxu1 %v579_v2 }
   0xb   :  { %589 = vmatpush.bf16.msra.mxu2 %v579_v2  ;;  %590 = vmatpush.bf16.msra.mxu3 %v579_v2 }
   0xe   :  { %147 = vmatpush.bf16.msra.mxu0 %v578_v3  ;;  %591 = vmatpush.bf16.msra.mxu1 %v578_v3 }
   0xf   :  { %592 = vmatpush.bf16.msra.mxu2 %v578_v3  ;;  %593 = vmatpush.bf16.msra.mxu3 %v578_v3 }
  0x12   :  { %148 = vmatpush.bf16.msra.mxu0 %v577_v4  ;;  %594 = vmatpush.bf16.msra.mxu1 %v577_v4 }
  0x13   :  { %595 = vmatpush.bf16.msra.mxu2 %v577_v4  ;;  %596 = vmatpush.bf16.msra.mxu3 %v577_v4 }
  0x16   :  { %149 = vmatpush.bf16.msra.mxu0 %v576_v5  ;;  %597 = vmatpush.bf16.msra.mxu1 %v576_v5 }
  0x17   :  { %598 = vmatpush.bf16.msra.mxu2 %v576_v5  ;;  %599 = vmatpush.bf16.msra.mxu3 %v576_v5 }
  0x1a   :  { %150 = vmatpush.bf16.msra.mxu0 %v575_v6  ;;  %600 = vmatpush.bf16.msra.mxu1 %v575_v6 }
  0x1b   :  { %601 = vmatpush.bf16.msra.mxu2 %v575_v6  ;;  %602 = vmatpush.bf16.msra.mxu3 %v575_v6 }
  0x1e   :  { %151 = vmatpush.bf16.msra.mxu0 %v574_v7  ;;  %603 = vmatpush.bf16.msra.mxu1 %v574_v7 }
  0x1f   :  { %604 = vmatpush.bf16.msra.mxu2 %v574_v7  ;;  %605 = vmatpush.bf16.msra.mxu3 %v574_v7 }
  0x21   :  { %152 = vmatmul.bf16.vlgmr.msra.gmra.mxu0 %v566_v8  ;;  %162 = vmatmul.bf16.vlgmr.msra.gmra.mxu1 %v568_v9 }
  0x22   :  { %172 = vmatmul.bf16.vlgmr.msra.gmra.mxu2 %v570_v10  ;;  %182 = vmatmul.bf16.vlgmr.msra.gmra.mxu3 %v572_v11 }
  0x31   :  { %157 = vmatmul.bf16.gmra.mxu0 %v567_v12  ;;  %167 = vmatmul.bf16.gmra.mxu1 %v569_v13 }
  0x32   :  { %177 = vmatmul.bf16.gmra.mxu2 %v571_v14  ;;  %187 = vmatmul.bf16.gmra.mxu3 %v573_v15 }
  0x9e   :  { %v153_v19 = vpop.f32.mrf.mxu0  ;;  %v163_v20 = vpop.f32.mrf.mxu1 }
  0x9f   :  { %v286_v21 = vadd.f32 %v688_v17, %v153_v19  ;;  %v290_v22 = vadd.f32 %v688_v17, %v163_v20 }
  0xa1   :  { %v302_v24 = vmax.f32 %v286_v21, 0.0  ;;  %v306_v25 = vmax.f32 %v290_v22, 0.0 }
  0xa3   :  { %318 = vst [vmem:[%s764_s3] sm:$0xff] %v302_v24  ;;  %v456_v40 = vmul.f32 %v302_v24, %v302_v24 }
  0xa4   :  { %322 = vst [vmem:[%s764_s3 + $0x20] sm:$0xff] %v306_v25 }
  0xa5   :  { %v173_v27 = vpop.f32.mrf.mxu2  ;;  %v183_v28 = vpop.f32.mrf.mxu3 }
  0xa6   :  { %v294_v29 = vadd.f32 %v688_v17, %v173_v27  ;;  %v298_v30 = vadd.f32 %v688_v17, %v183_v28  ;;  %v155_v31 = vpop.f32.mrf.mxu0  ;;  %v165_v32 = vpop.f32.mrf.mxu1 }
  0xa7   :  { %v287_v33 = vadd.f32 %v688_v17, %v155_v31  ;;  %v291_v34 = vadd.f32 %v688_v17, %v165_v32 }
  0xa8   :  { %v310_v35 = vmax.f32 %v294_v29, 0.0  ;;  %v314_v36 = vmax.f32 %v298_v30, 0.0 }
  0xa9   :  { %v303_v37 = vmax.f32 %v287_v33, 0.0  ;;  %v307_v38 = vmax.f32 %v291_v34, 0.0 }
  0xaa   :  { %326 = vst [vmem:[%s764_s3 + $0x40] sm:$0xff] %v310_v35 }
  0xab   :  { %330 = vst [vmem:[%s764_s3 + $0x60] sm:$0xff] %v314_v36  ;;  %v418_v39 = vsel %vm370_vm0, %v303_v37, 0.0 }
  0xac   :  { %319 = vst [vmem:[%s764_s3 + $0x8] sm:$0xff] %v303_v37  ;;  %v434_v41 = vadd.f32 %v418_v39, %v302_v24  ;;  %v457_v42 = vmul.f32 %v418_v39, %v418_v39 }
  0xad   :  { %323 = vst [vmem:[%s764_s3 + $0x28] sm:$0xff] %v307_v38  ;;  %v175_v43 = vpop.f32.mrf.mxu2  ;;  %v185_v44 = vpop.f32.mrf.mxu3 }
  0xae   :  { %v449_v45 = vrot.slane %v434_v41, 4  ;;  %v472_v46 = vadd.f32 %v457_v42, %v456_v40  ;;  %v295_v47 = vadd.f32 %v688_v17, %v175_v43  ;;  %v299_v48 = vadd.f32 %v688_v17, %v185_v44  ;;  %v158_v49 = vpop.f32.mrf.mxu0  ;;  %v168_v50 = vpop.f32.mrf.mxu1 }
  0xaf   :  { %v288_v51 = vadd.f32 %v688_v17, %v158_v49  ;;  %v292_v52 = vadd.f32 %v688_v17, %v168_v50 }
  0xb0   :  { %v450_v53 = vadd.f32 %v449_v45, %v434_v41  ;;  %v487_v54 = vrot.slane %v472_v46, 4  ;;  %v311_v55 = vmax.f32 %v295_v47, 0.0  ;;  %v315_v56 = vmax.f32 %v299_v48, 0.0 }
  0xb1   :  { %v304_v57 = vmax.f32 %v288_v51, 0.0  ;;  %v308_v58 = vmax.f32 %v292_v52, 0.0 }
  0xb2   :  { %v451_v59 = vrot.slane %v450_v53, 2  ;;  %v488_v60 = vadd.f32 %v487_v54, %v472_v46  ;;  %327 = vst [vmem:[%s764_s3 + $0x48] sm:$0xff] %v311_v55 }
  0xb3   :  { %331 = vst [vmem:[%s764_s3 + $0x68] sm:$0xff] %v315_v56 }
  0xb4   :  { %v452_v61 = vadd.f32 %v451_v59, %v450_v53  ;;  %v489_v62 = vrot.slane %v488_v60, 2  ;;  %320 = vst [vmem:[%s764_s3 + $0x10] sm:$0xff] %v304_v57 }
  0xb5   :  { %324 = vst [vmem:[%s764_s3 + $0x30] sm:$0xff] %v308_v58  ;;  %v178_v63 = vpop.f32.mrf.mxu2  ;;  %v188_v0 = vpop.f32.mrf.mxu3 }
  0xb6   :  { %v453_v1 = vrot.slane %v452_v61, 1  ;;  %v490_v2 = vadd.f32 %v489_v62, %v488_v60  ;;  %v296_v3 = vadd.f32 %v688_v17, %v178_v63  ;;  %v300_v4 = vadd.f32 %v688_v17, %v188_v0  ;;  %v160_v5 = vpop.f32.mrf.mxu0  ;;  %v170_v6 = vpop.f32.mrf.mxu1 }
  0xb7   :  { %v289_v7 = vadd.f32 %v688_v17, %v160_v5  ;;  %v293_v8 = vadd.f32 %v688_v17, %v170_v6 }
  0xb8   :  { %v454_v9 = vadd.f32 %v453_v1, %v452_v61  ;;  %v491_v10 = vrot.slane %v490_v2, 1  ;;  %v312_v11 = vmax.f32 %v296_v3, 0.0  ;;  %v316_v12 = vmax.f32 %v300_v4, 0.0 }
  0xb9   :  { %v305_v14 = vmax.f32 %v289_v7, 0.0  ;;  %v309_v15 = vmax.f32 %v293_v8, 0.0 }
  0xba   :  { %455 = vst [vmem:[%s763_s4] sm:$0x1] %v454_v9  ;;  %v492_v13 = vadd.f32 %v491_v10, %v490_v2 }
  0xbb   :  { %328 = vst [vmem:[%s764_s3 + $0x50] sm:$0xff] %v312_v11 }
  0xbc   :  { %493 = vst [vmem:[%s763_s4 + $0x1] sm:$0x1] %v492_v13 }
  0xbd   :  { %332 = vst [vmem:[%s764_s3 + $0x70] sm:$0xff] %v316_v12  ;;  %v180_v16 = vpop.f32.mrf.mxu2  ;;  %v190_v18 = vpop.f32.mrf.mxu3 }
  0xbe   :  { %321 = vst [vmem:[%s764_s3 + $0x18] sm:$0xff] %v305_v14  ;;  %v297_v19 = vadd.f32 %v688_v17, %v180_v16  ;;  %v301_v20 = vadd.f32 %v688_v17, %v190_v18 }
  0xbf   :  { %325 = vst [vmem:[%s764_s3 + $0x38] sm:$0xff] %v309_v15 }
  0xc0   :  { %v313_v21 = vmax.f32 %v297_v19, 0.0  ;;  %v317_v22 = vmax.f32 %v301_v20, 0.0 }
  0xc2   :  { %329 = vst [vmem:[%s764_s3 + $0x58] sm:$0xff] %v313_v21 }
  0xc3   :  { %333 = vst [vmem:[%s764_s3 + $0x78] sm:$0xff] %v317_v22 }

</bundles_post_ra>
